<compile_context>
chip_gen: v5e
topology: v5e:2x2
jax: 0.10.0
libtpu: 0.0.40
codegen_flags: <defaults>
</compile_context>

<pallas_src>
import functools
import math

import jax
import jax.numpy as jnp
from jax.experimental import pallas as pl
from jax.experimental.pallas import tpu as pltpu


def _mha_kernel(q_ref, k_ref, v_ref,
                wq_ref, bq_ref, wk_ref, bk_ref, wv_ref, bv_ref,
                wo_ref, bo_ref, o_ref, *,
                n_heads, d_head, inv_scale, matmul_dtype):
    xq = q_ref[0]          # [TQ, d_model]  (matmul_dtype)
    xk = k_ref[0]          # [S,  d_model]
    xv = v_ref[0]

    # Fused-head projections: one wide MXU push each (N = n_heads*d_head),
    # f32 accumulation, biases added in f32.
    qf = jnp.dot(xq, wq_ref[...], preferred_element_type=jnp.float32) + bq_ref[...]
    kf = jnp.dot(xk, wk_ref[...], preferred_element_type=jnp.float32) + bk_ref[...]
    vf = jnp.dot(xv, wv_ref[...], preferred_element_type=jnp.float32) + bv_ref[...]

    # Pre-scale q once on [TQ, H] (cheaper than scaling [TQ, S] scores per head).
    qs = (qf * inv_scale).astype(matmul_dtype)
    ks = kf.astype(matmul_dtype)
    vs = vf.astype(matmul_dtype)

    # Per-head attention on VMEM-resident data (static, unrolled head loop;
    # the per-head matmul shapes are intrinsic to attention with d_head heads).
    zs = []
    for h in range(n_heads):
        sl = slice(h * d_head, (h + 1) * d_head)
        q_h = qs[:, sl]                      # [TQ, d_head]
        k_h = ks[:, sl]                      # [S,  d_head]
        v_h = vs[:, sl]                      # [S,  d_head]

        # scores: contract last dims directly (no explicit k.T / XLU transpose)
        s_h = jax.lax.dot_general(q_h, k_h, (((1,), (1,)), ((), ())),
                                  preferred_element_type=jnp.float32)   # [TQ, S]

        # softmax along keys — kept in f32 (VPU/EUP friendly on all gens)
        m_h = jnp.max(s_h, axis=-1, keepdims=True)
        e_h = jnp.exp(s_h - m_h)
        p_h = e_h * pl.reciprocal(jnp.sum(e_h, axis=-1, keepdims=True), approx=True)
        # parity with torch.where(isnan(pattern), 0, pattern)
        p_h = jnp.where(jnp.isnan(p_h), 0.0, p_h)

        z_h = jnp.dot(p_h.astype(matmul_dtype), v_h,
                      preferred_element_type=jnp.float32)               # [TQ, d_head]
        zs.append(z_h)

    # Lane-dense [TQ, n_heads*d_head] context for a single wide output projection.
    zf = jnp.concatenate(zs, axis=-1).astype(matmul_dtype)

    # Output projection (K = n_heads*d_head) with b_O folded in: single store,
    # no zero-init / accumulation passes over the output block.
    o_ref[0] = (jnp.dot(zf, wo_ref[...], preferred_element_type=jnp.float32)
                + bo_ref[...])


def mha_forward(query, key, value, params, *,
                matmul_dtype=jnp.bfloat16, q_tile=128):
    """query/key/value: [B, S, d_model]. Returns [B, S, d_model] float32."""
    W_Q, b_Q, W_K, b_K, W_V, b_V, W_O, b_O = (
        params["W_Q"], params["b_Q"], params["W_K"], params["b_K"],
        params["W_V"], params["b_V"], params["W_O"], params["b_O"])
    B, S, d_model = query.shape
    n_heads, _, d_head = W_Q.shape
    H = n_heads * d_head
    inv_scale = 1.0 / math.sqrt(d_head)          # host-side scalar, no tracing

    # Fold heads into wide, lane-dense weights once in the wrapper.
    # qf[:, h*d_head + d] = sum_m x[m] * W_Q[h, m, d]  ->  [d_model, H]
    wq = jnp.transpose(W_Q, (1, 0, 2)).reshape(d_model, H).astype(matmul_dtype)
    wk = jnp.transpose(W_K, (1, 0, 2)).reshape(d_model, H).astype(matmul_dtype)
    wv = jnp.transpose(W_V, (1, 0, 2)).reshape(d_model, H).astype(matmul_dtype)
    wo = W_O.reshape(H, d_model).astype(matmul_dtype)        # [(h d), d_model]
    bq = b_Q.reshape(1, H).astype(jnp.float32)
    bk = b_K.reshape(1, H).astype(jnp.float32)
    bv = b_V.reshape(1, H).astype(jnp.float32)
    bo = b_O.reshape(1, d_model).astype(jnp.float32)

    # Cast activations once (halves HBM/VMEM bytes for the streamed inputs).
    xq = query.astype(matmul_dtype)
    xk = key.astype(matmul_dtype)
    xv = value.astype(matmul_dtype)

    # Query tiling: bounds VMEM for long S and adds a second parallel grid axis.
    tq = q_tile if (S > q_tile and S % q_tile == 0) else S
    n_qt = S // tq
    # K/V stay full-seq per batch element (block index independent of the
    # q-tile axis -> no re-DMA across q-tiles).  For very long S the next step
    # is a flash-style KV reduction axis with online softmax.

    kernel = functools.partial(_mha_kernel, n_heads=n_heads, d_head=d_head,
                               inv_scale=inv_scale, matmul_dtype=matmul_dtype)

    q_spec = pl.BlockSpec((1, tq, d_model), lambda b, i: (b, i, 0))
    kv_spec = pl.BlockSpec((1, S, d_model), lambda b, i: (b, 0, 0))
    w_in_spec = pl.BlockSpec((d_model, H), lambda b, i: (0, 0))   # grid-invariant
    b_in_spec = pl.BlockSpec((1, H), lambda b, i: (0, 0))
    wo_spec = pl.BlockSpec((H, d_model), lambda b, i: (0, 0))
    bo_spec = pl.BlockSpec((1, d_model), lambda b, i: (0, 0))
    out_spec = pl.BlockSpec((1, tq, d_model), lambda b, i: (b, i, 0))

    out = pl.pallas_call(
        kernel,
        out_shape=jax.ShapeDtypeStruct((B, S, d_model), jnp.float32),
        grid_spec=pltpu.PrefetchScalarGridSpec(
            num_scalar_prefetch=0,
            grid=(B, n_qt),
            in_specs=[q_spec, kv_spec, kv_spec,
                      w_in_spec, b_in_spec,
                      w_in_spec, b_in_spec,
                      w_in_spec, b_in_spec,
                      wo_spec, bo_spec],
            out_specs=out_spec,
        ),
        compiler_params=pltpu.CompilerParams(
            dimension_semantics=("parallel", "parallel"),
            vmem_limit_bytes=64 * 1024 * 1024),
    )(xq, xk, xv, wq, bq, wk, bk, wv, bv, wo, bo)
    return out


def _reference_mha(query, key, value, params):
    """Pure-JAX f32 reference mirroring the PyTorch forward exactly."""
    W_Q, b_Q, W_K, b_K, W_V, b_V, W_O, b_O = (
        params["W_Q"], params["b_Q"], params["W_K"], params["b_K"],
        params["W_V"], params["b_V"], params["W_O"], params["b_O"])
    d_head = W_Q.shape[-1]
    q = jnp.einsum("bsm,hmd->bshd", query, W_Q) + b_Q
    k = jnp.einsum("bsm,hmd->bshd", key, W_K) + b_K
    v = jnp.einsum("bsm,hmd->bshd", value, W_V) + b_V
    scores = jnp.einsum("bqhd,bkhd->bhqk", q, k) / jnp.sqrt(jnp.float32(d_head))
    pattern = jax.nn.softmax(scores, axis=-1)
    pattern = jnp.where(jnp.isnan(pattern), 0.0, pattern)
    z = jnp.einsum("bhqk,bkhd->bqhd", pattern, v)
    out = jnp.einsum("bqhd,hdm->bqm", z, W_O) + b_O
    return out


if __name__ == "__main__":
    d_model, d_head, n_heads = 32, 8, 4
    B, S = 2, 8

    root = jax.random.PRNGKey(0)
    keys = jax.random.split(root, 8)

    params = {
        "W_Q": jax.random.normal(keys[0], (n_heads, d_model, d_head), jnp.float32) * 0.1,
        "W_K": jax.random.normal(keys[1], (n_heads, d_model, d_head), jnp.float32) * 0.1,
        "W_V": jax.random.normal(keys[2], (n_heads, d_model, d_head), jnp.float32) * 0.1,
        "W_O": jax.random.normal(keys[3], (n_heads, d_head, d_model), jnp.float32) * 0.1,
        "b_Q": jnp.zeros((n_heads, d_head), jnp.float32),
        "b_K": jnp.zeros((n_heads, d_head), jnp.float32),
        "b_V": jnp.zeros((n_heads, d_head), jnp.float32),
        "b_O": jnp.zeros((d_model,), jnp.float32),
    }

    query = jax.random.normal(keys[4], (B, S, d_model), jnp.float32)
    key = jax.random.normal(keys[5], (B, S, d_model), jnp.float32)
    value = jax.random.normal(keys[6], (B, S, d_model), jnp.float32)

    out = mha_forward(query, key, value, params)
    jax.block_until_ready(out)

    ref = _reference_mha(query, key, value, params)
    # bf16 matmul operands (f32 accumulation) -> relaxed tolerance vs f32 reference.
    assert jnp.allclose(out, ref, atol=2e-2, rtol=2e-2), "mismatch vs reference"

    print("KERNEL_OK")
</pallas_src>

<mosaic_0001>
module attributes {stable_mosaic.version = 11 : i64} {
  func.func @_mha_kernel(%arg0: i32, %arg1: i32, %arg2: memref<1x8x32xbf16, #tpu.memory_space<vmem>>, %arg3: memref<1x8x32xbf16, #tpu.memory_space<vmem>>, %arg4: memref<1x8x32xbf16, #tpu.memory_space<vmem>>, %arg5: memref<32x32xbf16, #tpu.memory_space<vmem>>, %arg6: memref<1x32xf32, #tpu.memory_space<vmem>>, %arg7: memref<32x32xbf16, #tpu.memory_space<vmem>>, %arg8: memref<1x32xf32, #tpu.memory_space<vmem>>, %arg9: memref<32x32xbf16, #tpu.memory_space<vmem>>, %arg10: memref<1x32xf32, #tpu.memory_space<vmem>>, %arg11: memref<32x32xbf16, #tpu.memory_space<vmem>>, %arg12: memref<1x32xf32, #tpu.memory_space<vmem>>, %arg13: memref<1x8x32xf32, #tpu.memory_space<vmem>>) attributes {dimension_semantics = [#tpu.dimension_semantics<parallel>, #tpu.dimension_semantics<parallel>], iteration_bounds = array<i64: 2, 1>, scalar_prefetch = 0 : i64, scratch_operands = 0 : i64, tpu.core_type = #tpu.core_type<tc>, window_params = [{transform_indices = @transform_0, window_bounds = array<i64: 1, 8, 32>}, {transform_indices = @transform_1, window_bounds = array<i64: 1, 8, 32>}, {transform_indices = @transform_2, window_bounds = array<i64: 1, 8, 32>}, {pipeline_mode = #tpu.pipeline_mode<synchronous>, transform_indices = @transform_3, window_bounds = array<i64: 32, 32>}, {pipeline_mode = #tpu.pipeline_mode<synchronous>, transform_indices = @transform_4, window_bounds = array<i64: 1, 32>}, {pipeline_mode = #tpu.pipeline_mode<synchronous>, transform_indices = @transform_5, window_bounds = array<i64: 32, 32>}, {pipeline_mode = #tpu.pipeline_mode<synchronous>, transform_indices = @transform_6, window_bounds = array<i64: 1, 32>}, {pipeline_mode = #tpu.pipeline_mode<synchronous>, transform_indices = @transform_7, window_bounds = array<i64: 32, 32>}, {pipeline_mode = #tpu.pipeline_mode<synchronous>, transform_indices = @transform_8, window_bounds = array<i64: 1, 32>}, {pipeline_mode = #tpu.pipeline_mode<synchronous>, transform_indices = @transform_9, window_bounds = array<i64: 32, 32>}, {pipeline_mode = #tpu.pipeline_mode<synchronous>, transform_indices = @transform_10, window_bounds = array<i64: 1, 32>}, {transform_indices = @transform_11, window_bounds = array<i64: 1, 8, 32>}]} {
    %c0 = arith.constant 0 : index
    %c0_0 = arith.constant 0 : index
    %c0_1 = arith.constant 0 : index
    %0 = vector.load %arg2[%c0, %c0_0, %c0_1] : memref<1x8x32xbf16, #tpu.memory_space<vmem>>, vector<1x8x32xbf16>
    %1 = vector.shape_cast %0 : vector<1x8x32xbf16> to vector<8x32xbf16>
    %c0_2 = arith.constant 0 : index
    %c0_3 = arith.constant 0 : index
    %c0_4 = arith.constant 0 : index
    %2 = vector.load %arg3[%c0_2, %c0_3, %c0_4] : memref<1x8x32xbf16, #tpu.memory_space<vmem>>, vector<1x8x32xbf16>
    %3 = vector.shape_cast %2 : vector<1x8x32xbf16> to vector<8x32xbf16>
    %c0_5 = arith.constant 0 : index
    %c0_6 = arith.constant 0 : index
    %c0_7 = arith.constant 0 : index
    %4 = vector.load %arg4[%c0_5, %c0_6, %c0_7] : memref<1x8x32xbf16, #tpu.memory_space<vmem>>, vector<1x8x32xbf16>
    %5 = vector.shape_cast %4 : vector<1x8x32xbf16> to vector<8x32xbf16>
    %c0_8 = arith.constant 0 : index
    %c0_9 = arith.constant 0 : index
    %6 = vector.load %arg5[%c0_8, %c0_9] : memref<32x32xbf16, #tpu.memory_space<vmem>>, vector<32x32xbf16>
    %cst = arith.constant dense<0.000000e+00> : vector<8x32xf32>
    %7 = tpu.matmul %1, %6, %cst {dimension_numbers = #tpu.dot_dimension_numbers<[1], [0], [0], [1], [0, 0, 1, 1], [], []>} : vector<8x32xbf16>, vector<32x32xbf16>, vector<8x32xf32> -> vector<8x32xf32>
    %c0_10 = arith.constant 0 : index
    %c0_11 = arith.constant 0 : index
    %8 = vector.load %arg6[%c0_10, %c0_11] : memref<1x32xf32, #tpu.memory_space<vmem>>, vector<1x32xf32>
    %9 = vector.broadcast %8 : vector<1x32xf32> to vector<8x32xf32>
    %10 = arith.addf %7, %9 : vector<8x32xf32>
    %c0_12 = arith.constant 0 : index
    %c0_13 = arith.constant 0 : index
    %11 = vector.load %arg7[%c0_12, %c0_13] : memref<32x32xbf16, #tpu.memory_space<vmem>>, vector<32x32xbf16>
    %cst_14 = arith.constant dense<0.000000e+00> : vector<8x32xf32>
    %12 = tpu.matmul %3, %11, %cst_14 {dimension_numbers = #tpu.dot_dimension_numbers<[1], [0], [0], [1], [0, 0, 1, 1], [], []>} : vector<8x32xbf16>, vector<32x32xbf16>, vector<8x32xf32> -> vector<8x32xf32>
    %c0_15 = arith.constant 0 : index
    %c0_16 = arith.constant 0 : index
    %13 = vector.load %arg8[%c0_15, %c0_16] : memref<1x32xf32, #tpu.memory_space<vmem>>, vector<1x32xf32>
    %14 = vector.broadcast %13 : vector<1x32xf32> to vector<8x32xf32>
    %15 = arith.addf %12, %14 : vector<8x32xf32>
    %c0_17 = arith.constant 0 : index
    %c0_18 = arith.constant 0 : index
    %16 = vector.load %arg9[%c0_17, %c0_18] : memref<32x32xbf16, #tpu.memory_space<vmem>>, vector<32x32xbf16>
    %cst_19 = arith.constant dense<0.000000e+00> : vector<8x32xf32>
    %17 = tpu.matmul %5, %16, %cst_19 {dimension_numbers = #tpu.dot_dimension_numbers<[1], [0], [0], [1], [0, 0, 1, 1], [], []>} : vector<8x32xbf16>, vector<32x32xbf16>, vector<8x32xf32> -> vector<8x32xf32>
    %c0_20 = arith.constant 0 : index
    %c0_21 = arith.constant 0 : index
    %18 = vector.load %arg10[%c0_20, %c0_21] : memref<1x32xf32, #tpu.memory_space<vmem>>, vector<1x32xf32>
    %19 = vector.broadcast %18 : vector<1x32xf32> to vector<8x32xf32>
    %20 = arith.addf %17, %19 : vector<8x32xf32>
    %cst_22 = arith.constant 0.353553385 : f32
    %21 = vector.broadcast %cst_22 : f32 to vector<8x32xf32>
    %22 = arith.mulf %10, %21 : vector<8x32xf32>
    %23 = arith.truncf %22 : vector<8x32xf32> to vector<8x32xbf16>
    %24 = arith.truncf %15 : vector<8x32xf32> to vector<8x32xbf16>
    %25 = arith.truncf %20 : vector<8x32xf32> to vector<8x32xbf16>
    %26 = vector.extract_strided_slice %23 {offsets = [0, 0], sizes = [8, 8], strides = [1, 1]} : vector<8x32xbf16> to vector<8x8xbf16>
    %27 = vector.extract_strided_slice %24 {offsets = [0, 0], sizes = [8, 8], strides = [1, 1]} : vector<8x32xbf16> to vector<8x8xbf16>
    %28 = vector.extract_strided_slice %25 {offsets = [0, 0], sizes = [8, 8], strides = [1, 1]} : vector<8x32xbf16> to vector<8x8xbf16>
    %cst_23 = arith.constant dense<0.000000e+00> : vector<8x8xf32>
    %29 = tpu.matmul %26, %27, %cst_23 {dimension_numbers = #tpu.dot_dimension_numbers<[1], [1], [0], [0], [0, 0, 1, 0], [], []>} : vector<8x8xbf16>, vector<8x8xbf16>, vector<8x8xf32> -> vector<8x8xf32>
    %cst_24 = arith.constant dense<0xFF800000> : vector<8xf32>
    %30 = vector.multi_reduction <maximumf>, %29, %cst_24 [1] : vector<8x8xf32> to vector<8xf32>
    %31 = vector.shape_cast %30 : vector<8xf32> to vector<8x1xf32>
    %32 = vector.broadcast %31 : vector<8x1xf32> to vector<8x8xf32>
    %33 = arith.subf %29, %32 : vector<8x8xf32>
    %34 = math.exp %33 : vector<8x8xf32>
    %cst_25 = arith.constant dense<0.000000e+00> : vector<8xf32>
    %35 = vector.multi_reduction <add>, %34, %cst_25 [1] : vector<8x8xf32> to vector<8xf32>
    %36 = vector.shape_cast %35 : vector<8xf32> to vector<8x1xf32>
    %37 = tpu.reciprocal %36 {approx = true} : vector<8x1xf32> -> vector<8x1xf32>
    %38 = vector.broadcast %37 : vector<8x1xf32> to vector<8x8xf32>
    %39 = arith.mulf %34, %38 : vector<8x8xf32>
    %40 = arith.cmpf one, %39, %39 : vector<8x8xf32>
    %cst_26 = arith.constant 0.000000e+00 : f32
    %41 = vector.broadcast %cst_26 : f32 to vector<8x8xf32>
    %42 = arith.select %40, %41, %39 : vector<8x8xi1>, vector<8x8xf32>
    %43 = arith.truncf %42 : vector<8x8xf32> to vector<8x8xbf16>
    %cst_27 = arith.constant dense<0.000000e+00> : vector<8x8xf32>
    %44 = tpu.matmul %43, %28, %cst_27 {dimension_numbers = #tpu.dot_dimension_numbers<[1], [0], [0], [1], [0, 0, 1, 1], [], []>} : vector<8x8xbf16>, vector<8x8xbf16>, vector<8x8xf32> -> vector<8x8xf32>
    %45 = vector.extract_strided_slice %23 {offsets = [0, 8], sizes = [8, 8], strides = [1, 1]} : vector<8x32xbf16> to vector<8x8xbf16>
    %46 = vector.extract_strided_slice %24 {offsets = [0, 8], sizes = [8, 8], strides = [1, 1]} : vector<8x32xbf16> to vector<8x8xbf16>
    %47 = vector.extract_strided_slice %25 {offsets = [0, 8], sizes = [8, 8], strides = [1, 1]} : vector<8x32xbf16> to vector<8x8xbf16>
    %cst_28 = arith.constant dense<0.000000e+00> : vector<8x8xf32>
    %48 = tpu.matmul %45, %46, %cst_28 {dimension_numbers = #tpu.dot_dimension_numbers<[1], [1], [0], [0], [0, 0, 1, 0], [], []>} : vector<8x8xbf16>, vector<8x8xbf16>, vector<8x8xf32> -> vector<8x8xf32>
    %cst_29 = arith.constant dense<0xFF800000> : vector<8xf32>
    %49 = vector.multi_reduction <maximumf>, %48, %cst_29 [1] : vector<8x8xf32> to vector<8xf32>
    %50 = vector.shape_cast %49 : vector<8xf32> to vector<8x1xf32>
    %51 = vector.broadcast %50 : vector<8x1xf32> to vector<8x8xf32>
    %52 = arith.subf %48, %51 : vector<8x8xf32>
    %53 = math.exp %52 : vector<8x8xf32>
    %cst_30 = arith.constant dense<0.000000e+00> : vector<8xf32>
    %54 = vector.multi_reduction <add>, %53, %cst_30 [1] : vector<8x8xf32> to vector<8xf32>
    %55 = vector.shape_cast %54 : vector<8xf32> to vector<8x1xf32>
    %56 = tpu.reciprocal %55 {approx = true} : vector<8x1xf32> -> vector<8x1xf32>
    %57 = vector.broadcast %56 : vector<8x1xf32> to vector<8x8xf32>
    %58 = arith.mulf %53, %57 : vector<8x8xf32>
    %59 = arith.cmpf one, %58, %58 : vector<8x8xf32>
    %cst_31 = arith.constant 0.000000e+00 : f32
    %60 = vector.broadcast %cst_31 : f32 to vector<8x8xf32>
    %61 = arith.select %59, %60, %58 : vector<8x8xi1>, vector<8x8xf32>
    %62 = arith.truncf %61 : vector<8x8xf32> to vector<8x8xbf16>
    %cst_32 = arith.constant dense<0.000000e+00> : vector<8x8xf32>
    %63 = tpu.matmul %62, %47, %cst_32 {dimension_numbers = #tpu.dot_dimension_numbers<[1], [0], [0], [1], [0, 0, 1, 1], [], []>} : vector<8x8xbf16>, vector<8x8xbf16>, vector<8x8xf32> -> vector<8x8xf32>
    %64 = vector.extract_strided_slice %23 {offsets = [0, 16], sizes = [8, 8], strides = [1, 1]} : vector<8x32xbf16> to vector<8x8xbf16>
    %65 = vector.extract_strided_slice %24 {offsets = [0, 16], sizes = [8, 8], strides = [1, 1]} : vector<8x32xbf16> to vector<8x8xbf16>
    %66 = vector.extract_strided_slice %25 {offsets = [0, 16], sizes = [8, 8], strides = [1, 1]} : vector<8x32xbf16> to vector<8x8xbf16>
    %cst_33 = arith.constant dense<0.000000e+00> : vector<8x8xf32>
    %67 = tpu.matmul %64, %65, %cst_33 {dimension_numbers = #tpu.dot_dimension_numbers<[1], [1], [0], [0], [0, 0, 1, 0], [], []>} : vector<8x8xbf16>, vector<8x8xbf16>, vector<8x8xf32> -> vector<8x8xf32>
    %cst_34 = arith.constant dense<0xFF800000> : vector<8xf32>
    %68 = vector.multi_reduction <maximumf>, %67, %cst_34 [1] : vector<8x8xf32> to vector<8xf32>
    %69 = vector.shape_cast %68 : vector<8xf32> to vector<8x1xf32>
    %70 = vector.broadcast %69 : vector<8x1xf32> to vector<8x8xf32>
    %71 = arith.subf %67, %70 : vector<8x8xf32>
    %72 = math.exp %71 : vector<8x8xf32>
    %cst_35 = arith.constant dense<0.000000e+00> : vector<8xf32>
    %73 = vector.multi_reduction <add>, %72, %cst_35 [1] : vector<8x8xf32> to vector<8xf32>
    %74 = vector.shape_cast %73 : vector<8xf32> to vector<8x1xf32>
    %75 = tpu.reciprocal %74 {approx = true} : vector<8x1xf32> -> vector<8x1xf32>
    %76 = vector.broadcast %75 : vector<8x1xf32> to vector<8x8xf32>
    %77 = arith.mulf %72, %76 : vector<8x8xf32>
    %78 = arith.cmpf one, %77, %77 : vector<8x8xf32>
    %cst_36 = arith.constant 0.000000e+00 : f32
    %79 = vector.broadcast %cst_36 : f32 to vector<8x8xf32>
    %80 = arith.select %78, %79, %77 : vector<8x8xi1>, vector<8x8xf32>
    %81 = arith.truncf %80 : vector<8x8xf32> to vector<8x8xbf16>
    %cst_37 = arith.constant dense<0.000000e+00> : vector<8x8xf32>
    %82 = tpu.matmul %81, %66, %cst_37 {dimension_numbers = #tpu.dot_dimension_numbers<[1], [0], [0], [1], [0, 0, 1, 1], [], []>} : vector<8x8xbf16>, vector<8x8xbf16>, vector<8x8xf32> -> vector<8x8xf32>
    %83 = vector.extract_strided_slice %23 {offsets = [0, 24], sizes = [8, 8], strides = [1, 1]} : vector<8x32xbf16> to vector<8x8xbf16>
    %84 = vector.extract_strided_slice %24 {offsets = [0, 24], sizes = [8, 8], strides = [1, 1]} : vector<8x32xbf16> to vector<8x8xbf16>
    %85 = vector.extract_strided_slice %25 {offsets = [0, 24], sizes = [8, 8], strides = [1, 1]} : vector<8x32xbf16> to vector<8x8xbf16>
    %cst_38 = arith.constant dense<0.000000e+00> : vector<8x8xf32>
    %86 = tpu.matmul %83, %84, %cst_38 {dimension_numbers = #tpu.dot_dimension_numbers<[1], [1], [0], [0], [0, 0, 1, 0], [], []>} : vector<8x8xbf16>, vector<8x8xbf16>, vector<8x8xf32> -> vector<8x8xf32>
    %cst_39 = arith.constant dense<0xFF800000> : vector<8xf32>
    %87 = vector.multi_reduction <maximumf>, %86, %cst_39 [1] : vector<8x8xf32> to vector<8xf32>
    %88 = vector.shape_cast %87 : vector<8xf32> to vector<8x1xf32>
    %89 = vector.broadcast %88 : vector<8x1xf32> to vector<8x8xf32>
    %90 = arith.subf %86, %89 : vector<8x8xf32>
    %91 = math.exp %90 : vector<8x8xf32>
    %cst_40 = arith.constant dense<0.000000e+00> : vector<8xf32>
    %92 = vector.multi_reduction <add>, %91, %cst_40 [1] : vector<8x8xf32> to vector<8xf32>
    %93 = vector.shape_cast %92 : vector<8xf32> to vector<8x1xf32>
    %94 = tpu.reciprocal %93 {approx = true} : vector<8x1xf32> -> vector<8x1xf32>
    %95 = vector.broadcast %94 : vector<8x1xf32> to vector<8x8xf32>
    %96 = arith.mulf %91, %95 : vector<8x8xf32>
    %97 = arith.cmpf one, %96, %96 : vector<8x8xf32>
    %cst_41 = arith.constant 0.000000e+00 : f32
    %98 = vector.broadcast %cst_41 : f32 to vector<8x8xf32>
    %99 = arith.select %97, %98, %96 : vector<8x8xi1>, vector<8x8xf32>
    %100 = arith.truncf %99 : vector<8x8xf32> to vector<8x8xbf16>
    %cst_42 = arith.constant dense<0.000000e+00> : vector<8x8xf32>
    %101 = tpu.matmul %100, %85, %cst_42 {dimension_numbers = #tpu.dot_dimension_numbers<[1], [0], [0], [1], [0, 0, 1, 1], [], []>} : vector<8x8xbf16>, vector<8x8xbf16>, vector<8x8xf32> -> vector<8x8xf32>
    %102 = tpu.concatenate %44, %63, %82, %101 in 1 : vector<8x8xf32>, vector<8x8xf32>, vector<8x8xf32>, vector<8x8xf32> -> vector<8x32xf32>
    %103 = arith.truncf %102 : vector<8x32xf32> to vector<8x32xbf16>
    %c0_43 = arith.constant 0 : index
    %c0_44 = arith.constant 0 : index
    %104 = vector.load %arg11[%c0_43, %c0_44] : memref<32x32xbf16, #tpu.memory_space<vmem>>, vector<32x32xbf16>
    %cst_45 = arith.constant dense<0.000000e+00> : vector<8x32xf32>
    %105 = tpu.matmul %103, %104, %cst_45 {dimension_numbers = #tpu.dot_dimension_numbers<[1], [0], [0], [1], [0, 0, 1, 1], [], []>} : vector<8x32xbf16>, vector<32x32xbf16>, vector<8x32xf32> -> vector<8x32xf32>
    %c0_46 = arith.constant 0 : index
    %c0_47 = arith.constant 0 : index
    %106 = vector.load %arg12[%c0_46, %c0_47] : memref<1x32xf32, #tpu.memory_space<vmem>>, vector<1x32xf32>
    %107 = vector.broadcast %106 : vector<1x32xf32> to vector<8x32xf32>
    %108 = arith.addf %105, %107 : vector<8x32xf32>
    %c0_48 = arith.constant 0 : index
    %c0_49 = arith.constant 0 : index
    %c0_50 = arith.constant 0 : index
    %109 = vector.load %arg13[%c0_48, %c0_49, %c0_50] : memref<1x8x32xf32, #tpu.memory_space<vmem>>, vector<1x8x32xf32>
    %110 = vector.shape_cast %109 : vector<1x8x32xf32> to vector<8x32xf32>
    %111 = vector.shape_cast %108 : vector<8x32xf32> to vector<1x8x32xf32>
    tpu.vector_store %arg13[%c0_48, %c0_49, %c0_50], %111 {strides = array<i32>} : memref<1x8x32xf32, #tpu.memory_space<vmem>>, vector<1x8x32xf32>,
    return
  }
  func.func @transform_0(%arg0: i32, %arg1: i32) -> (i32, i32, i32) {
    %c0_i32 = arith.constant 0 : i32
    %c0_i32_0 = arith.constant 0 : i32
    return %arg0, %arg1, %c0_i32 : i32, i32, i32
  }
  func.func @transform_1(%arg0: i32, %arg1: i32) -> (i32, i32, i32) {
    %c0_i32 = arith.constant 0 : i32
    %c0_i32_0 = arith.constant 0 : i32
    %c0_i32_1 = arith.constant 0 : i32
    return %arg0, %c0_i32, %c0_i32_0 : i32, i32, i32
  }
  func.func @transform_2(%arg0: i32, %arg1: i32) -> (i32, i32, i32) {
    %c0_i32 = arith.constant 0 : i32
    %c0_i32_0 = arith.constant 0 : i32
    %c0_i32_1 = arith.constant 0 : i32
    return %arg0, %c0_i32, %c0_i32_0 : i32, i32, i32
  }
  func.func @transform_3(%arg0: i32, %arg1: i32) -> (i32, i32) {
    %c0_i32 = arith.constant 0 : i32
    %c0_i32_0 = arith.constant 0 : i32
    %c0_i32_1 = arith.constant 0 : i32
    return %c0_i32, %c0_i32_0 : i32, i32
  }
  func.func @transform_4(%arg0: i32, %arg1: i32) -> (i32, i32) {
    %c0_i32 = arith.constant 0 : i32
    %c0_i32_0 = arith.constant 0 : i32
    %c0_i32_1 = arith.constant 0 : i32
    return %c0_i32, %c0_i32_0 : i32, i32
  }
  func.func @transform_5(%arg0: i32, %arg1: i32) -> (i32, i32) {
    %c0_i32 = arith.constant 0 : i32
    %c0_i32_0 = arith.constant 0 : i32
    %c0_i32_1 = arith.constant 0 : i32
    return %c0_i32, %c0_i32_0 : i32, i32
  }
  func.func @transform_6(%arg0: i32, %arg1: i32) -> (i32, i32) {
    %c0_i32 = arith.constant 0 : i32
    %c0_i32_0 = arith.constant 0 : i32
    %c0_i32_1 = arith.constant 0 : i32
    return %c0_i32, %c0_i32_0 : i32, i32
  }
  func.func @transform_7(%arg0: i32, %arg1: i32) -> (i32, i32) {
    %c0_i32 = arith.constant 0 : i32
    %c0_i32_0 = arith.constant 0 : i32
    %c0_i32_1 = arith.constant 0 : i32
    return %c0_i32, %c0_i32_0 : i32, i32
  }
  func.func @transform_8(%arg0: i32, %arg1: i32) -> (i32, i32) {
    %c0_i32 = arith.constant 0 : i32
    %c0_i32_0 = arith.constant 0 : i32
    %c0_i32_1 = arith.constant 0 : i32
    return %c0_i32, %c0_i32_0 : i32, i32
  }
  func.func @transform_9(%arg0: i32, %arg1: i32) -> (i32, i32) {
    %c0_i32 = arith.constant 0 : i32
    %c0_i32_0 = arith.constant 0 : i32
    %c0_i32_1 = arith.constant 0 : i32
    return %c0_i32, %c0_i32_0 : i32, i32
  }
  func.func @transform_10(%arg0: i32, %arg1: i32) -> (i32, i32) {
    %c0_i32 = arith.constant 0 : i32
    %c0_i32_0 = arith.constant 0 : i32
    %c0_i32_1 = arith.constant 0 : i32
    return %c0_i32, %c0_i32_0 : i32, i32
  }
  func.func @transform_11(%arg0: i32, %arg1: i32) -> (i32, i32, i32) {
    %c0_i32 = arith.constant 0 : i32
    %c0_i32_0 = arith.constant 0 : i32
    return %arg0, %arg1, %c0_i32 : i32, i32, i32
  }
}

</mosaic_0001>

<bundles_post_ra>
// kernel: tpu_custom_call.1
= control target key start
LH: loop header
LB: loop body
LE: loop exit
PB: predicated region body
PF: predicated region fallthrough
CT: control target
= control target key end

     0   :  { %s2022_s0 = inlined_call_operand.hbm [shape: bf16[2,8,32], index: 0, kind: input, shape index: {}]   ;;  %s2023_s1 = inlined_call_operand.hbm [shape: bf16[2,8,32], index: 1, kind: input, shape index: {}]   ;;  %s2024_s2 = inlined_call_operand.hbm [shape: bf16[2,8,32], index: 2, kind: input, shape index: {}]   ;;  %s2025_s3 = inlined_call_operand.hbm [shape: bf16[32,32], index: 3, kind: input, shape index: {}]   ;;  %s2026_s4 = inlined_call_operand.vmem [shape: f32[1,32], index: 4, kind: input, shape index: {}]   ;;  %s2027_s5 = inlined_call_operand.hbm [shape: bf16[32,32], index: 5, kind: input, shape index: {}]   ;;  %s2028_s6 = inlined_call_operand.vmem [shape: f32[1,32], index: 6, kind: input, shape index: {}]   ;;  %s2029_s7 = inlined_call_operand.hbm [shape: bf16[32,32], index: 7, kind: input, shape index: {}]   ;;  %s2030_s8 = inlined_call_operand.vmem [shape: f32[1,32], index: 8, kind: input, shape index: {}]   ;;  %s2031_s9 = inlined_call_operand.hbm [shape: bf16[32,32], index: 9, kind: input, shape index: {}]   ;;  %s2032_s10 = inlined_call_operand.vmem [shape: f32[1,32], index: 10, kind: input, shape index: {}]   ;;  %s2033_s11 = inlined_call_operand.hbm [shape: f32[2,8,32], index: 11, kind: output, shape index: {}]  }
   0x1   :  { %2047 = sst [smem:[#allocation27_spill]] %s2022_s0 }
   0x2   :  { %2048 = sst [smem:[#allocation28_spill]] %s2023_s1 }
   0x3   :  { %2049 = sst [smem:[#allocation29_spill]] %s2025_s3 }
   0x4   :  { %2050 = sst [smem:[#allocation30_spill]] %s2027_s5 }
   0x5   :  { %2051 = sst [smem:[#allocation31_spill]] %s2029_s7 }
   0x6   :  { %2052 = sst [smem:[#allocation32_spill]] %s2031_s9 }
   0x7   :  { %2053 = sst [smem:[#allocation33_spill]] %s2032_s10 }
   0x8   :  { %16 = vsyncpa [#allocation3], 0 }
   0x9   :  { %18 = vsyncpa [#allocation3 + $0x1], 0 }
   0xa   :  { %19 = vsyncpa [#allocation6], 0 }
   0xb   :  { %21 = vsyncpa [#allocation6 + $0x1], 0 }
   0xc   :  { %22 = vsyncpa [#allocation9], 0 }
   0xd   :  { %23 = vsyncpa [#allocation12], 0 }
   0xe   :  { %24 = vsyncpa [#allocation4], 0 }
   0xf   :  { %26 = vsyncpa [#allocation4 + $0x1], 0  ;;  %s1747_s17 = smov 0   ;;  %s1749_s18 = smov 0  }
  0x10   :  { %s1751_s19 = smov 0   ;;  %s1753_s20 = smov 0  }
  0x11   :  { %s1755_s21 = smov 0   ;;  %s1757_s22 = smov 0  }
  0x12 LB: > { %2054 = sst [smem:[#allocation20_spill]] %s1653_s17  ;;  %s1778_s23 = sadd.s32 4294967295, %s1673_s22   ;;  %s1673_s22 = sphi %s1757_s22, %s32_s22   ;;  %s1669_s21 = sphi %s1755_s21, %s2084_s21   ;;  %s1665_s20 = sphi %s1753_s20, %s2083_s20   ;;  %s1661_s19 = sphi %s1751_s19, %s2087_s19   ;;  %s1657_s18 = sphi %s1749_s18, %s2086_s18   ;;  %s1653_s17 = sphi %s1747_s17, %s2085_s17  }
  0x13   : > { %2055 = sst [smem:[#allocation21_spill]] %s1669_s21  ;;  %p1151_p0 = scmp.ge.s32.totalorder %s1673_s22, 1 }
  0x14   : > { %2056 = sst [smem:[#allocation22_spill]] %s1673_s22  ;;  %p67_p1 = scmp.eq.s32.totalorder %s1778_s23, 0 }
  0x15   : > { %p325_p2 = scmp.lt.s32.totalorder %s1673_s22, 3  ;;  %s2057_s3 = sld [smem:[#allocation29_spill]] }
  0x16   : > { %s1675_s28 = smov [#allocation8]   ;;  %p1156_p6 = scmp.ge.s32.totalorder %s1673_s22, 2 }
  0x17   : > { %p1786_p3 = pnand %p1151_p0, %p325_p2  ;;  %s338_s29 = sshll.u32 %s1675_s28, 4  ;;  %s339_s29 = int_to_ptr.vmem [resolvable:$true] %s338_s29 }
  0x18   : > { %s2060_s7 = sld [smem:[#allocation31_spill]]  ;;  %s2034_s15 = smov 64  }
  0x19   : > { %p1252_p4 = pneg %p1786_p3  ;;  %s2036_s16 = smov 4  }
  0x1a   : > { %s1678_s24 = smov [#allocation11]   ;;  %s1150_s28 = sadd.s32 4294967294, %s1673_s22  }
  0x1b   : > { %s336_s26 = sshll.u32 %s2057_s3, 4  ;;  %p1794_p5 = pnand %p1252_p4, %p67_p1  ;;  %s337_s26 = int_to_ptr.hbm [resolvable:$true] %s336_s26 }
  0x1c   : > { %s372_s25 = sshll.u32 %s1678_s24, 4  ;;  %s44_s12 = sadd.s32 1, %s1669_s21  ;;  %s373_s25 = int_to_ptr.vmem [resolvable:$true] %s372_s25 }
  0x1d   : > { %1255 = dma.hbm_to_vmem [thread:$0]  (!%p1794_p5), %s337_s26, 256, %s339_s29, [#allocation9], %s2034_s15, %s2034_s15, %s2036_s16  }
  0x1e   : > { %s370_s14 = sshll.u32 %s2060_s7, 4  ;;  %p46_p7 = scmp.ge.s32.totalorder %s44_s12, 2  ;;  %s371_s14 = int_to_ptr.hbm [resolvable:$true] %s370_s14 }
  0x1f   : > { %1261 = dma.hbm_to_vmem [thread:$0]  (!%p1794_p5), %s371_s14, 256, %s373_s25, [#allocation12], %s2034_s15, %s2034_s15, %s2036_s16  }
  0x20   : > { %s53_s13 = sadd.s32 1, %s1661_s19  ;;  %p60_p8 = scmp.ne.s32.totalorder %s1661_s19, %s1657_s18 }
  0x21   : > { %p61_p9 = scmp.eq.s32.totalorder %s1673_s22, 0  ;;  %s2089_s12 = smov (%p46_p7, %s44_s12), 0 }
  0x22   : > { %2061 = sst [smem:[#allocation23_spill]] %s2089_s12  ;;  %p66_p11 = scmp.ne.s32.totalorder %s1657_s18, %s1653_s17 }
  0x23   : > { %p1820_p10 = por %p61_p9, %p60_p8  ;;  %s48_s29 = ssub.s32 %s1669_s21, %s2089_s12 }
  0x24   : > { %p312_p12 = scmp.eq.s32.totalorder %s1778_s23, 1  ;;  %p51_p13 = scmp.eq.s32.totalorder %s48_s29, 0 }
  0x25   : > { %p1831_p0 = por %p67_p1, %p66_p11  ;;  %p318_p4 = scmp.eq.s32.totalorder %s1150_s28, 1 }
  0x26   : > { %p1835_p2 = por %p312_p12, %p60_p8  ;;  %p1283_p9 = scmp.lt.s32.totalorder %s1673_s22, 2 }
  0x27   : > { %s1840_s25 = scalar_select %p51_p13, %s1661_s19, %s53_s13  }
  0x28   : > { %s2064_s24 = scalar_select %p1835_p2, 1, 0 }
  0x29   : > { %2066 = sst [smem:[#allocation25_spill]] %s1840_s25  ;;  %p1842_p7 = por %p318_p4, %p66_p11 }
  0x2a   : > { %2065 = sst [smem:[#allocation24_spill]] %s2064_s24  ;;  %s2042_s16 = sand.u32 1, %s1661_s19  }
  0x2b   : > { %s2067_s15 = scalar_select %p1842_p7, 1, 0 }
  0x2c   : > { %s1849_s3 = sshll.u32 %s1669_s21, 2  ;;  %s1853_s29 = sshll.u32 %s2042_s16, 2 }
  0x2d   : > { %2068 = sst [smem:[#allocation26_spill]] %s2067_s15  ;;  %p1857_p8 = pnand %p1283_p9, %p1820_p10 }
  0x2e   : > { %s426_s28 = sand.u32 1, %s1673_s22   ;;  %s2070_s1 = sld [smem:[#allocation28_spill]] }
  0x2f   : > { %s430_s15 = scalar_lea.vmem [#allocation5], %s1853_s29  ;;  %s2071_s5 = sld [smem:[#allocation30_spill]] }
  0x30   : > { %s438_s21 = sshll.u32 %s430_s15, 4  ;;  %s427_s24 = scalar_lea.sflag [#allocation6], %s426_s28  ;;  %s439_s21 = int_to_ptr.vmem [resolvable:$true] %s438_s21 }
  0x31   : > { %s1679_s22 = smov [#allocation10]   ;;  %s2072_s9 = sld [smem:[#allocation32_spill]] }
  0x32   : > { %s355_s12 = sshll.u32 %s1679_s22, 4  ;;  %s2074_s16 = smov 64   ;;  %s356_s12 = int_to_ptr.vmem [resolvable:$true] %s355_s12 }
  0x33   : > { %s1680_s28 = smov [#allocation13]   ;;  %s2075_s0 = sld [smem:[#allocation27_spill]] }
  0x34   : > { %s434_s25 = scalar_lea.hbm %s2070_s1, %s1849_s3  ;;  %s410_s13 = scalar_lea.vmem [#allocation2], %s1853_s29 }
  0x35   : > { %s436_s17 = sshll.u32 %s434_s25, 4  ;;  %s353_s10 = sshll.u32 %s2071_s5, 4  ;;  %s437_s17 = int_to_ptr.hbm [resolvable:$true] %s436_s17  ;;  %s354_s10 = int_to_ptr.hbm [resolvable:$true] %s353_s10 }
  0x36   : > { %1271 = dma.hbm_to_vmem [thread:$0]  (!%p1857_p8), %s437_s17, 64, %s439_s21, %s427_s24  }
  0x37   : > { %s387_s15 = sshll.u32 %s2072_s9, 4  ;;  %s2073_s25 = smov 4   ;;  %s388_s15 = int_to_ptr.hbm [resolvable:$true] %s387_s15 }
  0x38   : > { %1258 = dma.hbm_to_vmem [thread:$0]  (!%p1794_p5), %s354_s10, 256, %s356_s12, [#allocation9], %s2074_s16, %s2074_s16, %s2073_s25  }
  0x39   : > { %s389_s17 = sshll.u32 %s1680_s28, 4  ;;  %s415_s22 = scalar_lea.hbm %s2075_s0, %s1849_s3  ;;  %s390_s17 = int_to_ptr.vmem [resolvable:$true] %s389_s17 }
  0x3a   : > { %1264 = dma.hbm_to_vmem [thread:$0]  (!%p1794_p5), %s388_s15, 256, %s390_s17, [#allocation12], %s2074_s16, %s2074_s16, %s2073_s25  }
  0x3b   : > { %s417_s1 = sshll.u32 %s415_s22, 4  ;;  %s419_s5 = sshll.u32 %s410_s13, 4  ;;  %s418_s1 = int_to_ptr.hbm [resolvable:$true] %s417_s1  ;;  %s420_s5 = int_to_ptr.vmem [resolvable:$true] %s419_s5 }
  0x3c   : > { %s2076_s9 = sand.u32 1, %s1661_s19   ;;  %s453_s21 = scalar_lea.hbm %s2024_s2, %s1849_s3 }
  0x3d   : > { %s407_s10 = scalar_lea.sflag [#allocation3], %s2076_s9  ;;  %s455_s26 = sshll.u32 %s453_s21, 4  ;;  %s456_s26 = int_to_ptr.hbm [resolvable:$true] %s455_s26 }
  0x3e   : > { %1268 = dma.hbm_to_vmem [thread:$0]  (!%p1857_p8), %s418_s1, 64, %s420_s5, %s407_s10  }
  0x3f   : > { %s449_s0 = scalar_lea.vmem [#allocation7], %s1853_s29  ;;  %466 = sbr.rel (%p1786_p3) target bundleno = 1149 (0x47d), region = 64 }
  0x40   : > { %s457_s30 = sshll.u32 %s449_s0, 4  ;;  %s1904_s15 = sand.u32 (!%p1786_p3), 1, %s1657_s18   ;;  %s458_s30 = int_to_ptr.vmem [resolvable:$true] %s457_s30 }
  0x41   : > { %1274 = dma.hbm_to_vmem [thread:$0]  (!%p1857_p8), %s456_s26, 64, %s458_s30, %s427_s24  }
  0x42   : > { %s1907_s5 = sshll.u32 (!%p1786_p3), %s1904_s15, 2  ;;  %s469_s3 = scalar_lea.sflag (!%p1786_p3), [#allocation3], %s1904_s15 }
  0x43   : > { %s472_s9 = scalar_lea.vmem (!%p1786_p3), [#allocation2], %s1907_s5 }
  0x44   : > { %1632 = dma.done.wait (%p1831_p0), %s469_s3, 64  }
  0x45   : > { %1634 = vsyncadd (%p1831_p0), %s469_s3, 4294967232  ;;  %s478_s0 = sand.u32 1, %s1778_s23   ;;  %s482_s27 = scalar_lea.vmem [#allocation5], %s1907_s5 }
  0x46   : > { %s479_s7 = scalar_lea.sflag [#allocation6], %s478_s0 }
  0x47   : > { %1636 = dma.done.wait (%p1831_p0), %s479_s7, 128  }
  0x48   : > { %1638 = vsyncadd (%p1831_p0), %s479_s7, 4294967168  ;;  %s492_s24 = scalar_lea.vmem [#allocation7], %s1907_s5 }
  0x49   : > { %1640 = dma.done.wait (%p67_p1), [#allocation9], 512  }
  0x4a   : > { %1642 = vsyncadd (%p67_p1), [#allocation9], 4294966784 }
  0x4b   : > { %1644 = dma.done.wait (%p67_p1), [#allocation12], 512  }
  0x4c   : > { %1646 = vsyncadd (%p67_p1), [#allocation12], 4294966784  ;;  %v1221_v0 = vld [vmem:[#allocation8 + $0x8] sm:$0xff]  ;;  %v1223_v1 = vld [vmem:[#allocation10 + $0x8] sm:$0xff]  ;;  %vm586_vm0 = vcmask 261120   ;;  %vm679_vm1 = vcmask 64512  }
  0x4d   : > { %v1220_v2 = vld [vmem:[#allocation8] sm:$0xff]  ;;  %596 = vmatpush.bf16.msra.mxu0 %v1221_v0  ;;  %632 = vmatpush.bf16.msra.mxu1 %v1223_v1  ;;  %v1222_v3 = vld [vmem:[#allocation10] sm:$0xff]  ;;  %v563_v4 = vld [vmem:[%s472_s9] sm:$0xf]  ;;  %s1681_s16 = smov 112   ;;  %s1682_s17 = smov 120  }
  0x4e   : > { %v564_v5 = vld [vmem:[%s482_s27] sm:$0xf]  ;;  %v1349_v6 = vld [vmem:[%s2026_s4] ss:$0 sm:$0xff]  ;;  %s1683_s22 = smov 104   ;;  %v1224_v35 = vld [vmem:[#allocation11] sm:$0xff] }
  0x4f   : > { %v1350_v7 = vld [vmem:[%s2028_s6] ss:$0 sm:$0xff]  ;;  %v565_v36 = vld [vmem:[%s492_s24] sm:$0xf]  ;;  %vm716_vm2 = vcmask 1043456   ;;  %s1684_s10 = smov 8  }
  0x50   : > { %v1225_v22 = vld [vmem:[#allocation11 + $0x8] sm:$0xff]  ;;  %s1685_s12 = smov 24   ;;  %s1686_s28 = smov 16   ;;  %vm929_vm7 = vcmask 130048   ;;  %vm931_vm8 = vcmask 195584  }
  0x51   : > { %597 = vmatpush.bf16.msra.mxu0 %v1220_v2  ;;  %633 = vmatpush.bf16.msra.mxu1 %v1222_v3  ;;  %v1351_v51 = vld [vmem:[%s2030_s8] ss:$0 sm:$0xff]  ;;  %s1217_s21 = sshll.u32 %s1665_s20, 3  ;;  %s1171_s26 = sshll.u32 %s1904_s15, 3 }
  0x52   : > { %668 = vmatpush.bf16.msra.mxu2 %v1225_v22  ;;  %s983_s9 = scalar_lea.hbm %s2033_s11, %s1217_s21  ;;  %s2078_s27 = sld [smem:[#allocation33_spill]] }
  0x53   : > { %s561_s24 = scalar_lea.vmem [#allocation14], %s1171_s26  ;;  %s987_s29 = sshll.u32 %s983_s9, 4  ;;  %s988_s29 = int_to_ptr.hbm [resolvable:$true] %s987_s29 }
  0x54   : > { %1180 = vmatmul.msk.bf16.vlgmr.msra.gmra.mxu0 %vm586_vm0, %v563_v4  ;;  %1189 = vmatmul.msk.bf16.vlgmr.msra.gmra.mxu1 %vm586_vm0, %v564_v5  ;;  %s985_s14 = sshll.u32 %s561_s24, 4  ;;  %s972_s20 = scalar_lea.sflag [#allocation4], %s1904_s15  ;;  %s986_s14 = int_to_ptr.vmem [resolvable:$true] %s985_s14 }
  0x55   : > { %s1593_s23 = sshra.s32 %s988_s29, 4  ;;  %s1594_s23 = int_to_ptr.hbm [resolvable:$true] %s1593_s23 }
  0x56   : > { %669 = vmatpush.bf16.msra.mxu2 %v1224_v35  ;;  %s1595_s25 = scalar_lea.hbm %s1594_s23, 8  ;;  %p1600_p10 = scmp.lt.s32.totalorder %s1594_s23, %s2033_s11 }
  0x57   : > { %p1596_p1 = scmp.ne.s32.totalorder %s1594_s23, %s1595_s25 }
  0x59   : > { %1198 = vmatmul.msk.bf16.vlgmr.msra.gmra.mxu2 %vm586_vm0, %v565_v36  ;;  %p1597_p3 = pnand %p1596_p1, %p1835_p2 }
  0x5b   : > { %p1598_p5 = pneg %p1597_p3 }
  0xd1   : > { %v599_v8 = vpop.f32.mrf.mxu0  ;;  %v635_v9 = vpop.f32.mrf.mxu1 }
  0xd2   : > { %v600_v10 = vadd.f32 %v1349_v6, %v599_v8  ;;  %v636_v11 = vadd.f32 %v1350_v7, %v635_v9 }
  0xd4   : > { %v675_v12 = vmul.f32 0.35355338, %v600_v10  ;;  %v677_v13 = vpack.c.bf16 %v636_v11, %v636_v11 }
  0xd6   : > { %v676_v14 = vpack.c.bf16 %v675_v12, %v675_v12  ;;  %v739_v15 = vunpack.c.l.b16 %v677_v13  ;;  %v684_v16 = vsel %vm679_vm1, %v677_v13, 0 }
  0xd7   : > { %693 = vmatpush.bf16.xpose.msra.mxu3 %v684_v16 }
  0xd8   : > { %v734_v17 = vunpack.c.l.b16 %v676_v14  ;;  %v740_v18 = vpack.c.b16 %v739_v15, %v739_v15 }
  0xd9   : > { %v601_v19 = vpop.f32.mrf.mxu0  ;;  %v637_v20 = vpop.f32.mrf.mxu1 }
  0xda   : > { %802 = vrot.lane.b32.xlu1 %v740_v18, %s1681_s16  ;;  %741 = vrot.lane.b32.xlu0 %v740_v18, %s1682_s17  ;;  %v735_v21 = vpack.c.b16 %v734_v17, %v734_v17 }
  0xdc   : > { %800 = vrot.lane.b32.xlu2 %v735_v21, %s1681_s16  ;;  %v671_v52 = vpop.f32.mrf.mxu2 }
  0xdd   : > { %v672_v53 = vadd.f32 %v1351_v51, %v671_v52 }
  0xde   : > { %1199 = vmatmul.msk.bf16.vlgmr.msra.gmra.mxu3 %vm679_vm1, %v676_v14 }
  0xdf   : > { %v678_v54 = vpack.c.bf16 %v672_v53, %v672_v53  ;;  %v1352_v53 = vld [vmem:[%s2078_s27] ss:$0 sm:$0xff] }
  0xe1   : > { %v777_v55 = vunpack.c.l.b16 %v678_v54  ;;  %v718_v56 = vsel %vm716_vm2, %v678_v54, 0 }
  0xe2   : > { %860 = vrot.lane.b32.xlu1 %v740_v18, %s1683_s22  ;;  %736 = vrot.lane.b32.xlu0 %v735_v21, %s1682_s17 }
  0xe3   : > { %727 = vmatpush.bf16.msrb.mxu0 %v718_v56  ;;  %v778_v57 = vpack.c.b16 %v777_v55, %v777_v55 }
  0xe4   : > { %858 = vrot.lane.b32.xlu2 %v735_v21, %s1683_s22  ;;  %v673_v58 = vpop.f32.mrf.mxu2 }
 0x136   : > { %v801_v27 = vpop.permute.xlu2 %800 }
 0x13e   : > { %v859_v33 = vpop.permute.xlu2 %858 }
 0x14c   : > { %v803_v23 = vpop.permute.xlu1 %802  ;;  %v742_v24 = vpop.permute.xlu0 %741 }
 0x14d   : > { %v747_v25 = vsel %vm679_vm1, %v742_v24, 0  ;;  %v808_v26 = vsel %vm679_vm1, %v803_v23, 0 }
 0x14e   : > { %756 = vmatpush.bf16.xpose.msrb.mxu1 %v747_v25  ;;  %817 = vmatpush.bf16.xpose.msrb.mxu3 %v808_v26 }
 0x154   : > { %v861_v28 = vpop.permute.xlu1 %860  ;;  %v737_v29 = vpop.permute.xlu0 %736 }
 0x155   : > { %v866_v30 = vsel %vm679_vm1, %v861_v28, 0  ;;  %1201 = vmatmul.msk.bf16.vlgmr.msrb.gmra.mxu1 %vm679_vm1, %v737_v29  ;;  %1203 = vmatmul.msk.bf16.vlgmr.msrb.gmra.mxu3 %vm679_vm1, %v801_v27 }
 0x156   : > { %875 = vmatpush.bf16.xpose.msra.mxu1 %v866_v30 }
 0x161   : > { %v695_v31 = vpop.f32.mrf.mxu3 }
 0x162   : > { %v699_v32 = vsel %vm679_vm1, %v695_v31, -inf }
 0x163   : > { %700 = vmax.xlane.f32.xlu1 %v699_v32 }
 0x165   : > { %1205 = vmatmul.msk.bf16.vlgmr.msra.gmra.mxu1 %vm679_vm1, %v859_v33 }
 0x169   : > { %v697_v34 = vpop.f32.mrf.mxu3 }
 0x1d2   : > { %v758_v37 = vpop.f32.mrf.mxu1 }
 0x1d3   : > { %v762_v38 = vsel %vm679_vm1, %v758_v37, -inf }
 0x1d4   : > { %763 = vmax.xlane.f32.xlu0 %v762_v38 }
 0x1d6   : > { %v701_v39 = vpop.xlane.xlu1 %700 }
 0x1d7   : > { %v702_v40 = vsub.f32 %v695_v31, %v701_v39 }
 0x1d8   : > { %v819_v41 = vpop.f32.mrf.mxu3 }
 0x1d9   : > { %v703_v42 = vmul.f32 1.442695, %v702_v40  ;;  %v823_v50 = vsel %vm679_vm1, %v819_v41, -inf }
 0x1da   : > { %v760_v43 = vpop.f32.mrf.mxu1 }
 0x1db   : > { %1353 = vpow2.f32 %v703_v42 }
 0x1e0   : > { %v821_v44 = vpop.f32.mrf.mxu3 }
 0x1e1   : > { %v1354_v45 = vpop.eup %1353  ;;  %v1227_v44 = vld [vmem:[#allocation13 + $0x8] sm:$0xff] }
 0x1e2   : > { %v877_v46 = vpop.f32.mrf.mxu1  ;;  %v705_v47 = vsel %vm679_vm1, %v1354_v45, 0.0  ;;  %963 = vmatpush.bf16.msra.mxu3 %v1227_v44 }
 0x1e3   : > { %706 = vadd.xlane.f32.xlu1 %v705_v47  ;;  %v881_v48 = vsel %vm679_vm1, %v877_v46, -inf }
 0x1e4   : > { %882 = vmax.xlane.f32.xlu2 %v881_v48 }
 0x1ea   : > { %v879_v49 = vpop.f32.mrf.mxu1 }
 0x1ec   : > { %824 = vmax.xlane.f32.xlu2 %v823_v50 }
 0x204   : > { %779 = vrot.lane.b32.xlu2 %v778_v57, %s1682_s17 }
 0x247   : > { %v764_v59 = vpop.xlane.xlu0 %763 }
 0x248   : > { %v765_v60 = vsub.f32 %v758_v37, %v764_v59 }
 0x24a   : > { %v766_v61 = vmul.f32 1.442695, %v765_v60 }
 0x24c   : > { %1355 = vpow2.f32 %v766_v61 }
 0x252   : > { %v1356_v62 = vpop.eup %1355 }
 0x253   : > { %v768_v63 = vsel %vm679_vm1, %v1356_v62, 0.0 }
 0x254   : > { %769 = vadd.xlane.f32.xlu0 %v768_v63 }
 0x256   : > { %v707_v0 = vpop.xlane.xlu1 %706 }
 0x257   : > { %1357 = vrcp.f32 %v707_v0  ;;  %v883_v1 = vpop.xlane.xlu2 %882 }
 0x258   : > { %v884_v2 = vsub.f32 %v877_v46, %v883_v1 }
 0x25a   : > { %v885_v3 = vmul.f32 1.442695, %v884_v2 }
 0x25c   : > { %1359 = vpow2.f32 %v885_v3 }
 0x25d   : > { %v1358_v4 = vpop.eup %1357 }
 0x25e   : > { %v709_v5 = vmul.f32 %v1358_v4, %v1354_v45  ;;  %v1226_v45 = vld [vmem:[#allocation13] sm:$0xff] }
 0x25f   : > { %v825_v6 = vpop.xlane.xlu2 %824  ;;  %964 = vmatpush.bf16.msra.mxu3 %v1226_v45 }
 0x260   : > { %v826_v7 = vsub.f32 %v819_v41, %v825_v6  ;;  %vm710_vm3 = vcmp.ne.f32.partialorder %v709_v5, %v709_v5 }
 0x261   : > { %v711_v8 = vsel %vm710_vm3, 0.0, %v709_v5 }
 0x262   : > { %v1360_v9 = vpop.eup %1359  ;;  %v827_v10 = vmul.f32 1.442695, %v826_v7  ;;  %v712_v11 = vpack.c.bf16 %v711_v8, %v711_v8 }
 0x263   : > { %v887_v12 = vsel %vm679_vm1, %v1360_v9, 0.0 }
 0x264   : > { %1361 = vpow2.f32 %v827_v10  ;;  %888 = vadd.xlane.f32.xlu0 %v887_v12  ;;  %1200 = vmatmul.msk.bf16.vlgmr.msrb.gmra.mxu0 %vm679_vm1, %v712_v11 }
 0x267   : > { %v780_v15 = vpop.permute.xlu2 %779 }
 0x268   : > { %v785_v16 = vsel %vm716_vm2, %v780_v15, 0 }
 0x269   : > { %794 = vmatpush.bf16.msrb.mxu2 %v785_v16 }
 0x26a   : > { %v1362_v13 = vpop.eup %1361 }
 0x26b   : > { %v829_v14 = vsel %vm679_vm1, %v1362_v13, 0.0 }
 0x26c   : > { %830 = vadd.xlane.f32.xlu1 %v829_v14 }
 0x278   : > { %895 = vrot.lane.b32.xlu0 %v778_v57, %s1683_s22  ;;  %s1599_s22 = scalar_lea.hbm %s2033_s11, 16 }
 0x279   : > { %p1601_p11 = scmp.lt.s32.totalorder %s1599_s22, %s1595_s25 }
 0x27b   : > { %p1602_p12 = por %p1601_p11, %p1600_p10 }
 0x27d   : > { %p1603_p13 = pnand %p1602_p12, %p1598_p5 }
 0x285   : > { %837 = vrot.lane.b32.xlu1 %v778_v57, %s1681_s16 }
 0x2c7   : > { %v770_v17 = vpop.xlane.xlu0 %769 }
 0x2c8   : > { %1363 = vrcp.f32 %v770_v17 }
 0x2ce   : > { %v1364_v18 = vpop.eup %1363 }
 0x2cf   : > { %v772_v19 = vmul.f32 %v1364_v18, %v1356_v62 }
 0x2d1   : > { %vm773_vm4 = vcmp.ne.f32.partialorder %v772_v19, %v772_v19 }
 0x2d2   : > { %v774_v20 = vsel %vm773_vm4, 0.0, %v772_v19 }
 0x2d3   : > { %v775_v21 = vpack.c.bf16 %v774_v20, %v774_v20 }
 0x2d5   : > { %1202 = vmatmul.msk.bf16.vlgmr.msrb.gmra.mxu2 %vm679_vm1, %v775_v21 }
 0x2d7   : > { %v889_v22 = vpop.xlane.xlu0 %888 }
 0x2d8   : > { %1365 = vrcp.f32 %v889_v22 }
 0x2de   : > { %v1366_v23 = vpop.eup %1365 }
 0x2df   : > { %v891_v25 = vmul.f32 %v1366_v23, %v1360_v9  ;;  %v831_v26 = vpop.xlane.xlu1 %830 }
 0x2e0   : > { %1367 = vrcp.f32 %v831_v26 }
 0x2e1   : > { %v729_v24 = vpop.f32.mrf.mxu0  ;;  %vm892_vm5 = vcmp.ne.f32.partialorder %v891_v25, %v891_v25 }
 0x2e2   : > { %v893_v28 = vsel %vm892_vm5, 0.0, %v891_v25 }
 0x2e3   : > { %v894_v32 = vpack.c.bf16 %v893_v28, %v893_v28 }
 0x2e6   : > { %v1368_v31 = vpop.eup %1367 }
 0x2e7   : > { %v833_v33 = vmul.f32 %v1368_v31, %v1362_v13 }
 0x2e9   : > { %v731_v27 = vpop.f32.mrf.mxu0  ;;  %vm834_vm6 = vcmp.ne.f32.partialorder %v833_v33, %v833_v33 }
 0x2ea   : > { %v896_v29 = vpop.permute.xlu0 %895  ;;  %v835_v34 = vsel %vm834_vm6, 0.0, %v833_v33 }
 0x2eb   : > { %v901_v30 = vsel %vm716_vm2, %v896_v29, 0  ;;  %v836_v37 = vpack.c.bf16 %v835_v34, %v835_v34 }
 0x2ec   : > { %910 = vmatpush.bf16.msra.mxu2 %v901_v30 }
 0x2ef   : > { %1206 = vmatmul.msk.bf16.vlgmr.msra.gmra.mxu2 %vm679_vm1, %v894_v32 }
 0x2f7   : > { %v838_v35 = vpop.permute.xlu1 %837 }
 0x2f8   : > { %v843_v36 = vsel %vm716_vm2, %v838_v35, 0 }
 0x2f9   : > { %852 = vmatpush.bf16.msra.mxu0 %v843_v36 }
 0x2fc   : > { %1204 = vmatmul.msk.bf16.vlgmr.msra.gmra.mxu0 %vm679_vm1, %v836_v37 }
 0x358   : > { %v796_v38 = vpop.f32.mrf.mxu2 }
 0x359   : > { %917 = vrot.lane.b32.xlu2 %v796_v38, %s1684_s10 }
 0x360   : > { %v798_v39 = vpop.f32.mrf.mxu2 }
 0x372   : > { %v912_v40 = vpop.f32.mrf.mxu2 }
 0x373   : > { %925 = vrot.lane.b32.xlu2 %v912_v40, %s1685_s12 }
 0x379   : > { %v854_v41 = vpop.f32.mrf.mxu0 }
 0x37a   : > { %921 = vrot.lane.b32.xlu0 %v854_v41, %s1686_s28  ;;  %v914_v42 = vpop.f32.mrf.mxu2 }
 0x381   : > { %v856_v43 = vpop.f32.mrf.mxu0 }
 0x3b3   : > { %v918_v46 = vpop.permute.xlu2 %917 }
 0x3b4   : > { %v928_v47 = vsel %vm679_vm1, %v729_v24, %v918_v46 }
 0x3cd   : > { %v926_v49 = vpop.permute.xlu2 %925 }
 0x3ec   : > { %v922_v48 = vpop.permute.xlu0 %921 }
 0x3ed   : > { %v930_v50 = vsel %vm929_vm7, %v928_v47, %v922_v48 }
 0x3ee   : > { %v932_v51 = vsel %vm931_vm8, %v930_v50, %v926_v49 }
 0x3ef   : > { %v933_v52 = vpack.c.bf16 %v932_v51, %v932_v51 }
 0x3f1   : > { %1215 = vmatmul.msk.bf16.vlgmr.msra.gmra.mxu3 %vm586_vm0, %v933_v52 }
 0x474   : > { %v966_v54 = vpop.f32.mrf.mxu3 }
 0x475   : > { %v967_v55 = vadd.f32 %v1352_v53, %v966_v54 }
 0x477   : > { %970 = vst.msk [vmem:[%s561_s24] sm:$0xff] %vm586_vm0, %v967_v55 }
 0x478   : > { %1606 = shalt.err (!%p1603_p13)
}
 0x479   : > { %1250 = dma.vmem_to_hbm [thread:$0]  (%p1835_p2), %s986_s14, 128, %s988_s29, %s972_s20  }
 0x47c   : > { %v968_v56 = vpop.f32.mrf.mxu3 }
 0x47d PF: > { %s2079_s15 = sld [smem:[#allocation20_spill]]  ;;  %p1276_p0 = pnand %p1156_p6, %p1842_p7 }
 0x47e   : > { %s2081_s12 = sld [smem:[#allocation22_spill]] }
 0x47f   : > { %p1277_p4 = pneg %p1276_p0 }
 0x483   : > { %s999_s28 = sand.u32 1, %s2079_s15  }
 0x484   : > { %s1000_s21 = scalar_lea.sflag [#allocation4], %s999_s28 }
 0x485   : > { %1648 = dma.done.wait (%p1277_p4), %s1000_s21, 128  }
 0x486   : > { %1650 = vsyncadd (%p1277_p4), %s1000_s21, 4294967168  ;;  %s32_s22 = sadd.s32 1, %s2081_s12   ;;  %s2082_s26 = sld [smem:[#allocation25_spill]] }
 0x487   : > { %p29_p9 = scmp.ge.s32.totalorder %s32_s22, 4   ;;  %s2083_s20 = sld [smem:[#allocation21_spill]] }
 0x488   : > { %s2084_s21 = sld [smem:[#allocation23_spill]]  ;;  %s2085_s17 = smov %s1657_s18 }
 0x489   : > { %s2086_s18 = smov %s1661_s19  ;;  %31 = sbr.rel (!%p29_p9) target bundleno = 18 (0x12), region = 149 }
 0x48c   : > { %s2087_s19 = smov %s2082_s26 }
 0x48e   :  { %1006 = vsyncpa [#allocation3], 1 }
 0x48f   :  { %1008 = vsyncpa [#allocation3 + $0x1], 1 }
 0x490   :  { %1009 = vsyncpa [#allocation6], 1 }
 0x491   :  { %1011 = vsyncpa [#allocation6 + $0x1], 1 }
 0x492   :  { %1012 = vsyncpa [#allocation9], 1 }
 0x493   :  { %1013 = vsyncpa [#allocation12], 1 }
 0x494   :  { %1014 = vsyncpa [#allocation4], 1 }
 0x495   :  { %1016 = vsyncpa [#allocation4 + $0x1], 1 }

</bundles_post_ra>
